<compile_context>
chip_gen: v5e
topology: v5e:2x2
jax: 0.10.0
libtpu: 0.0.40
codegen_flags: <defaults>
</compile_context>

<pallas_src>
import jax
import jax.numpy as jnp
from jax.experimental import pallas as pl
from jax.experimental.pallas import tpu as pltpu


def _char_decoder_kernel(x_ref, wx_ref, wh_ref, b_ref, wp_ref, bp_ref,
                         h0_ref, c0_ref,
                         scores_ref, hN_ref, cN_ref):
    L, B, E = x_ref.shape
    H = wh_ref.shape[0]
    Vp = wp_ref.shape[1]

    # ---- Hoisted input projection: one big MXU push, bias folded in once. ----
    x_all = x_ref[...].reshape(L * B, E)                                   # (L*B, E)
    xw = (jnp.dot(x_all, wx_ref[...], preferred_element_type=jnp.float32)
          + b_ref[...])                                                    # (L*B, 4H)

    wh = wh_ref[...]                                                       # (H, 4H)
    h = h0_ref[...]                                                        # (B, H)
    c = c0_ref[...]                                                        # (B, H)

    # ---- Sequential recurrence; only h @ wh stays on the serial path. ----
    # L is a static Python int -> fully unrolled, all slice indices static.
    hs = []
    for t in range(L):
        gates = xw[t * B:(t + 1) * B, :] + jnp.dot(
            h, wh, preferred_element_type=jnp.float32)                     # (B, 4H)
        # NOTE: gate slices are lane-aligned only when H % 128 == 0; at H=32
        # these are 32-lane selects out of one 128-lane vreg (cheap at this size).
        i_g = jax.nn.sigmoid(gates[:, 0 * H:1 * H])
        f_g = jax.nn.sigmoid(gates[:, 1 * H:2 * H])
        g_g = jnp.tanh(gates[:, 2 * H:3 * H])
        o_g = jax.nn.sigmoid(gates[:, 3 * H:4 * H])
        c = f_g * c + i_g * g_g
        h = o_g * jnp.tanh(c)
        hs.append(h)

    hN_ref[...] = h
    cN_ref[...] = c

    # ---- Hoisted, lane-dense output projection: one (L*B,H)x(H,Vp) matmul. ----
    h_all = jnp.concatenate(hs, axis=0)                                    # (L*B, H)
    scores = (jnp.dot(h_all, wp_ref[...], preferred_element_type=jnp.float32)
              + bp_ref[...])                                               # (L*B, Vp)
    scores_ref[...] = scores.reshape(L, B, Vp)


def char_decoder_forward(char_ids, params, dec_hidden=None):
    """Equivalent of CharDecoder.forward.

    char_ids : (L, B) int32
    params   : dict with 'emb' (V,E), 'w_ih' (4H,E), 'w_hh' (4H,H),
               'b_ih' (4H,), 'b_hh' (4H,), 'w_proj' (V,H), 'b_proj' (V,)
    dec_hidden: optional tuple of (1,B,H) tensors.

    Returns (scores (L,B,V), (h (1,B,H), c (1,B,H))).
    """
    L, B = char_ids.shape
    V, E = params['emb'].shape
    H = params['w_hh'].shape[1]
    Vp = ((V + 127) // 128) * 128   # lane-dense projection width

    # Glue: embedding lookup + weight transposition / bias fusion / lane padding.
    x = jnp.take(params['emb'], char_ids, axis=0).astype(jnp.float32)      # (L, B, E)
    wx = params['w_ih'].T.astype(jnp.float32)                              # (E, 4H)
    wh = params['w_hh'].T.astype(jnp.float32)                              # (H, 4H)
    b = (params['b_ih'] + params['b_hh']).astype(jnp.float32)[None, :]     # (1, 4H)
    wp = jnp.zeros((H, Vp), jnp.float32).at[:, :V].set(
        params['w_proj'].T.astype(jnp.float32))                            # (H, Vp)
    bp = jnp.zeros((1, Vp), jnp.float32).at[:, :V].set(
        params['b_proj'].astype(jnp.float32))                              # (1, Vp)

    if dec_hidden is None:
        h0 = jnp.zeros((B, H), jnp.float32)
        c0 = jnp.zeros((B, H), jnp.float32)
    else:
        h0 = dec_hidden[0][0].astype(jnp.float32)
        c0 = dec_hidden[1][0].astype(jnp.float32)

    # Single invocation; everything VMEM-resident (tiny footprint at these shapes).
    # TODO(synk): at production sizes (large V/L/B), chunk the time axis so the
    # resident scores block stays within v7x's 64 MiB VMEM, add a batch-parallel
    # grid axis for the second TensorCore, and use bf16 matmul inputs on v6e/v7x.
    scores_p, h_n, c_n = pl.pallas_call(
        _char_decoder_kernel,
        out_shape=(
            jax.ShapeDtypeStruct((L, B, Vp), jnp.float32),
            jax.ShapeDtypeStruct((B, H), jnp.float32),
            jax.ShapeDtypeStruct((B, H), jnp.float32),
        ),
        grid=(1,),
        in_specs=[
            pl.BlockSpec((L, B, E), lambda i: (0, 0, 0)),   # x
            pl.BlockSpec((E, 4 * H), lambda i: (0, 0)),     # wx
            pl.BlockSpec((H, 4 * H), lambda i: (0, 0)),     # wh
            pl.BlockSpec((1, 4 * H), lambda i: (0, 0)),     # fused bias
            pl.BlockSpec((H, Vp), lambda i: (0, 0)),        # wp (lane-padded)
            pl.BlockSpec((1, Vp), lambda i: (0, 0)),        # bp (lane-padded)
            pl.BlockSpec((B, H), lambda i: (0, 0)),         # h0
            pl.BlockSpec((B, H), lambda i: (0, 0)),         # c0
        ],
        out_specs=(
            pl.BlockSpec((L, B, Vp), lambda i: (0, 0, 0)),  # scores (padded)
            pl.BlockSpec((B, H), lambda i: (0, 0)),         # h final
            pl.BlockSpec((B, H), lambda i: (0, 0)),         # c final
        ),
        compiler_params=pltpu.CompilerParams(
            dimension_semantics=("arbitrary",),
        ),
    )(x, wx, wh, b, wp, bp, h0, c0)

    scores = scores_p[..., :V]
    return scores, (h_n[None, ...], c_n[None, ...])


def _reference_forward(char_ids, params, dec_hidden=None):
    """Pure-JAX reference (lax.scan LSTM) for a sanity check."""
    x = jnp.take(params['emb'], char_ids, axis=0).astype(jnp.float32)
    H = params['w_hh'].shape[1]
    B = char_ids.shape[1]
    wx = params['w_ih'].T
    wh = params['w_hh'].T
    b = params['b_ih'] + params['b_hh']
    if dec_hidden is None:
        h0 = jnp.zeros((B, H), jnp.float32)
        c0 = jnp.zeros((B, H), jnp.float32)
    else:
        h0, c0 = dec_hidden[0][0], dec_hidden[1][0]

    def step(carry, x_t):
        h, c = carry
        gates = x_t @ wx + h @ wh + b
        i = jax.nn.sigmoid(gates[:, 0 * H:1 * H])
        f = jax.nn.sigmoid(gates[:, 1 * H:2 * H])
        g = jnp.tanh(gates[:, 2 * H:3 * H])
        o = jax.nn.sigmoid(gates[:, 3 * H:4 * H])
        c = f * c + i * g
        h = o * jnp.tanh(c)
        return (h, c), h

    (h_n, c_n), hs = jax.lax.scan(step, (h0, c0), x)
    scores = hs @ params['w_proj'].T + params['b_proj']
    return scores, (h_n[None], c_n[None])


if __name__ == "__main__":
    # Small shapes consistent with CharDecoder: length=8, batch=2,
    # hidden_size=32, char_embedding_size=50, char vocab=30.
    L, B, H, E, V = 8, 2, 32, 50, 30
    PAD_IDX = 0

    key = jax.random.PRNGKey(0)
    ks = jax.random.split(key, 9)
    bound = 1.0 / jnp.sqrt(H)

    emb = jax.random.normal(ks[0], (V, E), jnp.float32) * 0.1
    emb = emb.at[PAD_IDX].set(0.0)  # padding_idx row zeroed, as in nn.Embedding

    params = {
        'emb': emb,
        'w_ih': jax.random.uniform(ks[1], (4 * H, E), jnp.float32, -bound, bound),
        'w_hh': jax.random.uniform(ks[2], (4 * H, H), jnp.float32, -bound, bound),
        'b_ih': jax.random.uniform(ks[3], (4 * H,), jnp.float32, -bound, bound),
        'b_hh': jax.random.uniform(ks[4], (4 * H,), jnp.float32, -bound, bound),
        'w_proj': jax.random.uniform(ks[5], (V, H), jnp.float32, -bound, bound),
        'b_proj': jax.random.uniform(ks[6], (V,), jnp.float32, -bound, bound),
    }

    char_ids = jax.random.randint(ks[7], (L, B), 0, V, dtype=jnp.int32)
    dec_hidden = (
        jax.random.normal(ks[8], (1, B, H), jnp.float32) * 0.5,
        jax.random.normal(jax.random.fold_in(ks[8], 1), (1, B, H), jnp.float32) * 0.5,
    )

    scores, (h_n, c_n) = char_decoder_forward(char_ids, params, dec_hidden)
    jax.block_until_ready((scores, h_n, c_n))

    ref_scores, (ref_h, ref_c) = _reference_forward(char_ids, params, dec_hidden)
    assert scores.shape == (L, B, V)
    assert h_n.shape == (1, B, H) and c_n.shape == (1, B, H)
    assert jnp.allclose(scores, ref_scores, atol=2e-2, rtol=2e-2)
    assert jnp.allclose(h_n, ref_h, atol=2e-2, rtol=2e-2)
    assert jnp.allclose(c_n, ref_c, atol=2e-2, rtol=2e-2)

    print("KERNEL_OK")
</pallas_src>

<mosaic_0001>
module attributes {stable_mosaic.version = 11 : i64} {
  func.func @_char_decoder_kernel(%arg0: i32, %arg1: memref<8x2x50xf32, #tpu.memory_space<vmem>>, %arg2: memref<50x128xf32, #tpu.memory_space<vmem>>, %arg3: memref<32x128xf32, #tpu.memory_space<vmem>>, %arg4: memref<1x128xf32, #tpu.memory_space<vmem>>, %arg5: memref<32x128xf32, #tpu.memory_space<vmem>>, %arg6: memref<1x128xf32, #tpu.memory_space<vmem>>, %arg7: memref<2x32xf32, #tpu.memory_space<vmem>>, %arg8: memref<2x32xf32, #tpu.memory_space<vmem>>, %arg9: memref<8x2x128xf32, #tpu.memory_space<vmem>>, %arg10: memref<2x32xf32, #tpu.memory_space<vmem>>, %arg11: memref<2x32xf32, #tpu.memory_space<vmem>>) attributes {dimension_semantics = [#tpu.dimension_semantics<arbitrary>], iteration_bounds = array<i64: 1>, scalar_prefetch = 0 : i64, scratch_operands = 0 : i64, tpu.core_type = #tpu.core_type<tc>, window_params = [{pipeline_mode = #tpu.pipeline_mode<synchronous>, transform_indices = @transform_0, window_bounds = array<i64: 8, 2, 50>}, {pipeline_mode = #tpu.pipeline_mode<synchronous>, transform_indices = @transform_1, window_bounds = array<i64: 50, 128>}, {pipeline_mode = #tpu.pipeline_mode<synchronous>, transform_indices = @transform_2, window_bounds = array<i64: 32, 128>}, {pipeline_mode = #tpu.pipeline_mode<synchronous>, transform_indices = @transform_3, window_bounds = array<i64: 1, 128>}, {pipeline_mode = #tpu.pipeline_mode<synchronous>, transform_indices = @transform_4, window_bounds = array<i64: 32, 128>}, {pipeline_mode = #tpu.pipeline_mode<synchronous>, transform_indices = @transform_5, window_bounds = array<i64: 1, 128>}, {pipeline_mode = #tpu.pipeline_mode<synchronous>, transform_indices = @transform_6, window_bounds = array<i64: 2, 32>}, {pipeline_mode = #tpu.pipeline_mode<synchronous>, transform_indices = @transform_7, window_bounds = array<i64: 2, 32>}, {pipeline_mode = #tpu.pipeline_mode<synchronous>, transform_indices = @transform_8, window_bounds = array<i64: 8, 2, 128>}, {pipeline_mode = #tpu.pipeline_mode<synchronous>, transform_indices = @transform_9, window_bounds = array<i64: 2, 32>}, {pipeline_mode = #tpu.pipeline_mode<synchronous>, transform_indices = @transform_10, window_bounds = array<i64: 2, 32>}]} {
    %c0 = arith.constant 0 : index
    %c0_0 = arith.constant 0 : index
    %c0_1 = arith.constant 0 : index
    %0 = vector.load %arg1[%c0, %c0_0, %c0_1] : memref<8x2x50xf32, #tpu.memory_space<vmem>>, vector<8x2x50xf32>
    %1 = vector.shape_cast %0 : vector<8x2x50xf32> to vector<16x50xf32>
    %c0_2 = arith.constant 0 : index
    %c0_3 = arith.constant 0 : index
    %2 = vector.load %arg2[%c0_2, %c0_3] : memref<50x128xf32, #tpu.memory_space<vmem>>, vector<50x128xf32>
    %cst = arith.constant dense<0.000000e+00> : vector<16x128xf32>
    %3 = tpu.matmul %1, %2, %cst {dimension_numbers = #tpu.dot_dimension_numbers<[1], [0], [0], [1], [0, 0, 1, 1], [], []>} : vector<16x50xf32>, vector<50x128xf32>, vector<16x128xf32> -> vector<16x128xf32>
    %c0_4 = arith.constant 0 : index
    %c0_5 = arith.constant 0 : index
    %4 = vector.load %arg4[%c0_4, %c0_5] : memref<1x128xf32, #tpu.memory_space<vmem>>, vector<1x128xf32>
    %5 = vector.broadcast %4 : vector<1x128xf32> to vector<16x128xf32>
    %6 = arith.addf %3, %5 : vector<16x128xf32>
    %c0_6 = arith.constant 0 : index
    %c0_7 = arith.constant 0 : index
    %7 = vector.load %arg3[%c0_6, %c0_7] : memref<32x128xf32, #tpu.memory_space<vmem>>, vector<32x128xf32>
    %c0_8 = arith.constant 0 : index
    %c0_9 = arith.constant 0 : index
    %8 = vector.load %arg7[%c0_8, %c0_9] : memref<2x32xf32, #tpu.memory_space<vmem>>, vector<2x32xf32>
    %c0_10 = arith.constant 0 : index
    %c0_11 = arith.constant 0 : index
    %9 = vector.load %arg8[%c0_10, %c0_11] : memref<2x32xf32, #tpu.memory_space<vmem>>, vector<2x32xf32>
    %10 = vector.extract_strided_slice %6 {offsets = [0, 0], sizes = [2, 128], strides = [1, 1]} : vector<16x128xf32> to vector<2x128xf32>
    %cst_12 = arith.constant dense<0.000000e+00> : vector<2x128xf32>
    %11 = tpu.matmul %8, %7, %cst_12 {dimension_numbers = #tpu.dot_dimension_numbers<[1], [0], [0], [1], [0, 0, 1, 1], [], []>} : vector<2x32xf32>, vector<32x128xf32>, vector<2x128xf32> -> vector<2x128xf32>
    %12 = arith.addf %10, %11 : vector<2x128xf32>
    %13 = vector.extract_strided_slice %12 {offsets = [0, 0], sizes = [2, 32], strides = [1, 1]} : vector<2x128xf32> to vector<2x32xf32>
    %14 = arith.negf %13 : vector<2x32xf32>
    %15 = math.exp %14 : vector<2x32xf32>
    %cst_13 = arith.constant 1.000000e+00 : f32
    %16 = vector.broadcast %cst_13 : f32 to vector<2x32xf32>
    %17 = arith.addf %16, %15 : vector<2x32xf32>
    %18 = arith.divf %16, %17 : vector<2x32xf32>
    %19 = vector.extract_strided_slice %12 {offsets = [0, 32], sizes = [2, 32], strides = [1, 1]} : vector<2x128xf32> to vector<2x32xf32>
    %20 = arith.negf %19 : vector<2x32xf32>
    %21 = math.exp %20 : vector<2x32xf32>
    %cst_14 = arith.constant 1.000000e+00 : f32
    %22 = vector.broadcast %cst_14 : f32 to vector<2x32xf32>
    %23 = arith.addf %22, %21 : vector<2x32xf32>
    %24 = arith.divf %22, %23 : vector<2x32xf32>
    %25 = vector.extract_strided_slice %12 {offsets = [0, 64], sizes = [2, 32], strides = [1, 1]} : vector<2x128xf32> to vector<2x32xf32>
    %26 = math.tanh %25 : vector<2x32xf32>
    %27 = vector.extract_strided_slice %12 {offsets = [0, 96], sizes = [2, 32], strides = [1, 1]} : vector<2x128xf32> to vector<2x32xf32>
    %28 = arith.negf %27 : vector<2x32xf32>
    %29 = math.exp %28 : vector<2x32xf32>
    %cst_15 = arith.constant 1.000000e+00 : f32
    %30 = vector.broadcast %cst_15 : f32 to vector<2x32xf32>
    %31 = arith.addf %30, %29 : vector<2x32xf32>
    %32 = arith.divf %30, %31 : vector<2x32xf32>
    %33 = arith.mulf %24, %9 : vector<2x32xf32>
    %34 = arith.mulf %18, %26 : vector<2x32xf32>
    %35 = arith.addf %33, %34 : vector<2x32xf32>
    %36 = math.tanh %35 : vector<2x32xf32>
    %37 = arith.mulf %32, %36 : vector<2x32xf32>
    %38 = vector.extract_strided_slice %6 {offsets = [2, 0], sizes = [2, 128], strides = [1, 1]} : vector<16x128xf32> to vector<2x128xf32>
    %cst_16 = arith.constant dense<0.000000e+00> : vector<2x128xf32>
    %39 = tpu.matmul %37, %7, %cst_16 {dimension_numbers = #tpu.dot_dimension_numbers<[1], [0], [0], [1], [0, 0, 1, 1], [], []>} : vector<2x32xf32>, vector<32x128xf32>, vector<2x128xf32> -> vector<2x128xf32>
    %40 = arith.addf %38, %39 : vector<2x128xf32>
    %41 = vector.extract_strided_slice %40 {offsets = [0, 0], sizes = [2, 32], strides = [1, 1]} : vector<2x128xf32> to vector<2x32xf32>
    %42 = arith.negf %41 : vector<2x32xf32>
    %43 = math.exp %42 : vector<2x32xf32>
    %cst_17 = arith.constant 1.000000e+00 : f32
    %44 = vector.broadcast %cst_17 : f32 to vector<2x32xf32>
    %45 = arith.addf %44, %43 : vector<2x32xf32>
    %46 = arith.divf %44, %45 : vector<2x32xf32>
    %47 = vector.extract_strided_slice %40 {offsets = [0, 32], sizes = [2, 32], strides = [1, 1]} : vector<2x128xf32> to vector<2x32xf32>
    %48 = arith.negf %47 : vector<2x32xf32>
    %49 = math.exp %48 : vector<2x32xf32>
    %cst_18 = arith.constant 1.000000e+00 : f32
    %50 = vector.broadcast %cst_18 : f32 to vector<2x32xf32>
    %51 = arith.addf %50, %49 : vector<2x32xf32>
    %52 = arith.divf %50, %51 : vector<2x32xf32>
    %53 = vector.extract_strided_slice %40 {offsets = [0, 64], sizes = [2, 32], strides = [1, 1]} : vector<2x128xf32> to vector<2x32xf32>
    %54 = math.tanh %53 : vector<2x32xf32>
    %55 = vector.extract_strided_slice %40 {offsets = [0, 96], sizes = [2, 32], strides = [1, 1]} : vector<2x128xf32> to vector<2x32xf32>
    %56 = arith.negf %55 : vector<2x32xf32>
    %57 = math.exp %56 : vector<2x32xf32>
    %cst_19 = arith.constant 1.000000e+00 : f32
    %58 = vector.broadcast %cst_19 : f32 to vector<2x32xf32>
    %59 = arith.addf %58, %57 : vector<2x32xf32>
    %60 = arith.divf %58, %59 : vector<2x32xf32>
    %61 = arith.mulf %52, %35 : vector<2x32xf32>
    %62 = arith.mulf %46, %54 : vector<2x32xf32>
    %63 = arith.addf %61, %62 : vector<2x32xf32>
    %64 = math.tanh %63 : vector<2x32xf32>
    %65 = arith.mulf %60, %64 : vector<2x32xf32>
    %66 = vector.extract_strided_slice %6 {offsets = [4, 0], sizes = [2, 128], strides = [1, 1]} : vector<16x128xf32> to vector<2x128xf32>
    %cst_20 = arith.constant dense<0.000000e+00> : vector<2x128xf32>
    %67 = tpu.matmul %65, %7, %cst_20 {dimension_numbers = #tpu.dot_dimension_numbers<[1], [0], [0], [1], [0, 0, 1, 1], [], []>} : vector<2x32xf32>, vector<32x128xf32>, vector<2x128xf32> -> vector<2x128xf32>
    %68 = arith.addf %66, %67 : vector<2x128xf32>
    %69 = vector.extract_strided_slice %68 {offsets = [0, 0], sizes = [2, 32], strides = [1, 1]} : vector<2x128xf32> to vector<2x32xf32>
    %70 = arith.negf %69 : vector<2x32xf32>
    %71 = math.exp %70 : vector<2x32xf32>
    %cst_21 = arith.constant 1.000000e+00 : f32
    %72 = vector.broadcast %cst_21 : f32 to vector<2x32xf32>
    %73 = arith.addf %72, %71 : vector<2x32xf32>
    %74 = arith.divf %72, %73 : vector<2x32xf32>
    %75 = vector.extract_strided_slice %68 {offsets = [0, 32], sizes = [2, 32], strides = [1, 1]} : vector<2x128xf32> to vector<2x32xf32>
    %76 = arith.negf %75 : vector<2x32xf32>
    %77 = math.exp %76 : vector<2x32xf32>
    %cst_22 = arith.constant 1.000000e+00 : f32
    %78 = vector.broadcast %cst_22 : f32 to vector<2x32xf32>
    %79 = arith.addf %78, %77 : vector<2x32xf32>
    %80 = arith.divf %78, %79 : vector<2x32xf32>
    %81 = vector.extract_strided_slice %68 {offsets = [0, 64], sizes = [2, 32], strides = [1, 1]} : vector<2x128xf32> to vector<2x32xf32>
    %82 = math.tanh %81 : vector<2x32xf32>
    %83 = vector.extract_strided_slice %68 {offsets = [0, 96], sizes = [2, 32], strides = [1, 1]} : vector<2x128xf32> to vector<2x32xf32>
    %84 = arith.negf %83 : vector<2x32xf32>
    %85 = math.exp %84 : vector<2x32xf32>
    %cst_23 = arith.constant 1.000000e+00 : f32
    %86 = vector.broadcast %cst_23 : f32 to vector<2x32xf32>
    %87 = arith.addf %86, %85 : vector<2x32xf32>
    %88 = arith.divf %86, %87 : vector<2x32xf32>
    %89 = arith.mulf %80, %63 : vector<2x32xf32>
    %90 = arith.mulf %74, %82 : vector<2x32xf32>
    %91 = arith.addf %89, %90 : vector<2x32xf32>
    %92 = math.tanh %91 : vector<2x32xf32>
    %93 = arith.mulf %88, %92 : vector<2x32xf32>
    %94 = vector.extract_strided_slice %6 {offsets = [6, 0], sizes = [2, 128], strides = [1, 1]} : vector<16x128xf32> to vector<2x128xf32>
    %cst_24 = arith.constant dense<0.000000e+00> : vector<2x128xf32>
    %95 = tpu.matmul %93, %7, %cst_24 {dimension_numbers = #tpu.dot_dimension_numbers<[1], [0], [0], [1], [0, 0, 1, 1], [], []>} : vector<2x32xf32>, vector<32x128xf32>, vector<2x128xf32> -> vector<2x128xf32>
    %96 = arith.addf %94, %95 : vector<2x128xf32>
    %97 = vector.extract_strided_slice %96 {offsets = [0, 0], sizes = [2, 32], strides = [1, 1]} : vector<2x128xf32> to vector<2x32xf32>
    %98 = arith.negf %97 : vector<2x32xf32>
    %99 = math.exp %98 : vector<2x32xf32>
    %cst_25 = arith.constant 1.000000e+00 : f32
    %100 = vector.broadcast %cst_25 : f32 to vector<2x32xf32>
    %101 = arith.addf %100, %99 : vector<2x32xf32>
    %102 = arith.divf %100, %101 : vector<2x32xf32>
    %103 = vector.extract_strided_slice %96 {offsets = [0, 32], sizes = [2, 32], strides = [1, 1]} : vector<2x128xf32> to vector<2x32xf32>
    %104 = arith.negf %103 : vector<2x32xf32>
    %105 = math.exp %104 : vector<2x32xf32>
    %cst_26 = arith.constant 1.000000e+00 : f32
    %106 = vector.broadcast %cst_26 : f32 to vector<2x32xf32>
    %107 = arith.addf %106, %105 : vector<2x32xf32>
    %108 = arith.divf %106, %107 : vector<2x32xf32>
    %109 = vector.extract_strided_slice %96 {offsets = [0, 64], sizes = [2, 32], strides = [1, 1]} : vector<2x128xf32> to vector<2x32xf32>
    %110 = math.tanh %109 : vector<2x32xf32>
    %111 = vector.extract_strided_slice %96 {offsets = [0, 96], sizes = [2, 32], strides = [1, 1]} : vector<2x128xf32> to vector<2x32xf32>
    %112 = arith.negf %111 : vector<2x32xf32>
    %113 = math.exp %112 : vector<2x32xf32>
    %cst_27 = arith.constant 1.000000e+00 : f32
    %114 = vector.broadcast %cst_27 : f32 to vector<2x32xf32>
    %115 = arith.addf %114, %113 : vector<2x32xf32>
    %116 = arith.divf %114, %115 : vector<2x32xf32>
    %117 = arith.mulf %108, %91 : vector<2x32xf32>
    %118 = arith.mulf %102, %110 : vector<2x32xf32>
    %119 = arith.addf %117, %118 : vector<2x32xf32>
    %120 = math.tanh %119 : vector<2x32xf32>
    %121 = arith.mulf %116, %120 : vector<2x32xf32>
    %122 = vector.extract_strided_slice %6 {offsets = [8, 0], sizes = [2, 128], strides = [1, 1]} : vector<16x128xf32> to vector<2x128xf32>
    %cst_28 = arith.constant dense<0.000000e+00> : vector<2x128xf32>
    %123 = tpu.matmul %121, %7, %cst_28 {dimension_numbers = #tpu.dot_dimension_numbers<[1], [0], [0], [1], [0, 0, 1, 1], [], []>} : vector<2x32xf32>, vector<32x128xf32>, vector<2x128xf32> -> vector<2x128xf32>
    %124 = arith.addf %122, %123 : vector<2x128xf32>
    %125 = vector.extract_strided_slice %124 {offsets = [0, 0], sizes = [2, 32], strides = [1, 1]} : vector<2x128xf32> to vector<2x32xf32>
    %126 = arith.negf %125 : vector<2x32xf32>
    %127 = math.exp %126 : vector<2x32xf32>
    %cst_29 = arith.constant 1.000000e+00 : f32
    %128 = vector.broadcast %cst_29 : f32 to vector<2x32xf32>
    %129 = arith.addf %128, %127 : vector<2x32xf32>
    %130 = arith.divf %128, %129 : vector<2x32xf32>
    %131 = vector.extract_strided_slice %124 {offsets = [0, 32], sizes = [2, 32], strides = [1, 1]} : vector<2x128xf32> to vector<2x32xf32>
    %132 = arith.negf %131 : vector<2x32xf32>
    %133 = math.exp %132 : vector<2x32xf32>
    %cst_30 = arith.constant 1.000000e+00 : f32
    %134 = vector.broadcast %cst_30 : f32 to vector<2x32xf32>
    %135 = arith.addf %134, %133 : vector<2x32xf32>
    %136 = arith.divf %134, %135 : vector<2x32xf32>
    %137 = vector.extract_strided_slice %124 {offsets = [0, 64], sizes = [2, 32], strides = [1, 1]} : vector<2x128xf32> to vector<2x32xf32>
    %138 = math.tanh %137 : vector<2x32xf32>
    %139 = vector.extract_strided_slice %124 {offsets = [0, 96], sizes = [2, 32], strides = [1, 1]} : vector<2x128xf32> to vector<2x32xf32>
    %140 = arith.negf %139 : vector<2x32xf32>
    %141 = math.exp %140 : vector<2x32xf32>
    %cst_31 = arith.constant 1.000000e+00 : f32
    %142 = vector.broadcast %cst_31 : f32 to vector<2x32xf32>
    %143 = arith.addf %142, %141 : vector<2x32xf32>
    %144 = arith.divf %142, %143 : vector<2x32xf32>
    %145 = arith.mulf %136, %119 : vector<2x32xf32>
    %146 = arith.mulf %130, %138 : vector<2x32xf32>
    %147 = arith.addf %145, %146 : vector<2x32xf32>
    %148 = math.tanh %147 : vector<2x32xf32>
    %149 = arith.mulf %144, %148 : vector<2x32xf32>
    %150 = vector.extract_strided_slice %6 {offsets = [10, 0], sizes = [2, 128], strides = [1, 1]} : vector<16x128xf32> to vector<2x128xf32>
    %cst_32 = arith.constant dense<0.000000e+00> : vector<2x128xf32>
    %151 = tpu.matmul %149, %7, %cst_32 {dimension_numbers = #tpu.dot_dimension_numbers<[1], [0], [0], [1], [0, 0, 1, 1], [], []>} : vector<2x32xf32>, vector<32x128xf32>, vector<2x128xf32> -> vector<2x128xf32>
    %152 = arith.addf %150, %151 : vector<2x128xf32>
    %153 = vector.extract_strided_slice %152 {offsets = [0, 0], sizes = [2, 32], strides = [1, 1]} : vector<2x128xf32> to vector<2x32xf32>
    %154 = arith.negf %153 : vector<2x32xf32>
    %155 = math.exp %154 : vector<2x32xf32>
    %cst_33 = arith.constant 1.000000e+00 : f32
    %156 = vector.broadcast %cst_33 : f32 to vector<2x32xf32>
    %157 = arith.addf %156, %155 : vector<2x32xf32>
    %158 = arith.divf %156, %157 : vector<2x32xf32>
    %159 = vector.extract_strided_slice %152 {offsets = [0, 32], sizes = [2, 32], strides = [1, 1]} : vector<2x128xf32> to vector<2x32xf32>
    %160 = arith.negf %159 : vector<2x32xf32>
    %161 = math.exp %160 : vector<2x32xf32>
    %cst_34 = arith.constant 1.000000e+00 : f32
    %162 = vector.broadcast %cst_34 : f32 to vector<2x32xf32>
    %163 = arith.addf %162, %161 : vector<2x32xf32>
    %164 = arith.divf %162, %163 : vector<2x32xf32>
    %165 = vector.extract_strided_slice %152 {offsets = [0, 64], sizes = [2, 32], strides = [1, 1]} : vector<2x128xf32> to vector<2x32xf32>
    %166 = math.tanh %165 : vector<2x32xf32>
    %167 = vector.extract_strided_slice %152 {offsets = [0, 96], sizes = [2, 32], strides = [1, 1]} : vector<2x128xf32> to vector<2x32xf32>
    %168 = arith.negf %167 : vector<2x32xf32>
    %169 = math.exp %168 : vector<2x32xf32>
    %cst_35 = arith.constant 1.000000e+00 : f32
    %170 = vector.broadcast %cst_35 : f32 to vector<2x32xf32>
    %171 = arith.addf %170, %169 : vector<2x32xf32>
    %172 = arith.divf %170, %171 : vector<2x32xf32>
    %173 = arith.mulf %164, %147 : vector<2x32xf32>
    %174 = arith.mulf %158, %166 : vector<2x32xf32>
    %175 = arith.addf %173, %174 : vector<2x32xf32>
    %176 = math.tanh %175 : vector<2x32xf32>
    %177 = arith.mulf %172, %176 : vector<2x32xf32>
    %178 = vector.extract_strided_slice %6 {offsets = [12, 0], sizes = [2, 128], strides = [1, 1]} : vector<16x128xf32> to vector<2x128xf32>
    %cst_36 = arith.constant dense<0.000000e+00> : vector<2x128xf32>
    %179 = tpu.matmul %177, %7, %cst_36 {dimension_numbers = #tpu.dot_dimension_numbers<[1], [0], [0], [1], [0, 0, 1, 1], [], []>} : vector<2x32xf32>, vector<32x128xf32>, vector<2x128xf32> -> vector<2x128xf32>
    %180 = arith.addf %178, %179 : vector<2x128xf32>
    %181 = vector.extract_strided_slice %180 {offsets = [0, 0], sizes = [2, 32], strides = [1, 1]} : vector<2x128xf32> to vector<2x32xf32>
    %182 = arith.negf %181 : vector<2x32xf32>
    %183 = math.exp %182 : vector<2x32xf32>
    %cst_37 = arith.constant 1.000000e+00 : f32
    %184 = vector.broadcast %cst_37 : f32 to vector<2x32xf32>
    %185 = arith.addf %184, %183 : vector<2x32xf32>
    %186 = arith.divf %184, %185 : vector<2x32xf32>
    %187 = vector.extract_strided_slice %180 {offsets = [0, 32], sizes = [2, 32], strides = [1, 1]} : vector<2x128xf32> to vector<2x32xf32>
    %188 = arith.negf %187 : vector<2x32xf32>
    %189 = math.exp %188 : vector<2x32xf32>
    %cst_38 = arith.constant 1.000000e+00 : f32
    %190 = vector.broadcast %cst_38 : f32 to vector<2x32xf32>
    %191 = arith.addf %190, %189 : vector<2x32xf32>
    %192 = arith.divf %190, %191 : vector<2x32xf32>
    %193 = vector.extract_strided_slice %180 {offsets = [0, 64], sizes = [2, 32], strides = [1, 1]} : vector<2x128xf32> to vector<2x32xf32>
    %194 = math.tanh %193 : vector<2x32xf32>
    %195 = vector.extract_strided_slice %180 {offsets = [0, 96], sizes = [2, 32], strides = [1, 1]} : vector<2x128xf32> to vector<2x32xf32>
    %196 = arith.negf %195 : vector<2x32xf32>
    %197 = math.exp %196 : vector<2x32xf32>
    %cst_39 = arith.constant 1.000000e+00 : f32
    %198 = vector.broadcast %cst_39 : f32 to vector<2x32xf32>
    %199 = arith.addf %198, %197 : vector<2x32xf32>
    %200 = arith.divf %198, %199 : vector<2x32xf32>
    %201 = arith.mulf %192, %175 : vector<2x32xf32>
    %202 = arith.mulf %186, %194 : vector<2x32xf32>
    %203 = arith.addf %201, %202 : vector<2x32xf32>
    %204 = math.tanh %203 : vector<2x32xf32>
    %205 = arith.mulf %200, %204 : vector<2x32xf32>
    %206 = vector.extract_strided_slice %6 {offsets = [14, 0], sizes = [2, 128], strides = [1, 1]} : vector<16x128xf32> to vector<2x128xf32>
    %cst_40 = arith.constant dense<0.000000e+00> : vector<2x128xf32>
    %207 = tpu.matmul %205, %7, %cst_40 {dimension_numbers = #tpu.dot_dimension_numbers<[1], [0], [0], [1], [0, 0, 1, 1], [], []>} : vector<2x32xf32>, vector<32x128xf32>, vector<2x128xf32> -> vector<2x128xf32>
    %208 = arith.addf %206, %207 : vector<2x128xf32>
    %209 = vector.extract_strided_slice %208 {offsets = [0, 0], sizes = [2, 32], strides = [1, 1]} : vector<2x128xf32> to vector<2x32xf32>
    %210 = arith.negf %209 : vector<2x32xf32>
    %211 = math.exp %210 : vector<2x32xf32>
    %cst_41 = arith.constant 1.000000e+00 : f32
    %212 = vector.broadcast %cst_41 : f32 to vector<2x32xf32>
    %213 = arith.addf %212, %211 : vector<2x32xf32>
    %214 = arith.divf %212, %213 : vector<2x32xf32>
    %215 = vector.extract_strided_slice %208 {offsets = [0, 32], sizes = [2, 32], strides = [1, 1]} : vector<2x128xf32> to vector<2x32xf32>
    %216 = arith.negf %215 : vector<2x32xf32>
    %217 = math.exp %216 : vector<2x32xf32>
    %cst_42 = arith.constant 1.000000e+00 : f32
    %218 = vector.broadcast %cst_42 : f32 to vector<2x32xf32>
    %219 = arith.addf %218, %217 : vector<2x32xf32>
    %220 = arith.divf %218, %219 : vector<2x32xf32>
    %221 = vector.extract_strided_slice %208 {offsets = [0, 64], sizes = [2, 32], strides = [1, 1]} : vector<2x128xf32> to vector<2x32xf32>
    %222 = math.tanh %221 : vector<2x32xf32>
    %223 = vector.extract_strided_slice %208 {offsets = [0, 96], sizes = [2, 32], strides = [1, 1]} : vector<2x128xf32> to vector<2x32xf32>
    %224 = arith.negf %223 : vector<2x32xf32>
    %225 = math.exp %224 : vector<2x32xf32>
    %cst_43 = arith.constant 1.000000e+00 : f32
    %226 = vector.broadcast %cst_43 : f32 to vector<2x32xf32>
    %227 = arith.addf %226, %225 : vector<2x32xf32>
    %228 = arith.divf %226, %227 : vector<2x32xf32>
    %229 = arith.mulf %220, %203 : vector<2x32xf32>
    %230 = arith.mulf %214, %222 : vector<2x32xf32>
    %231 = arith.addf %229, %230 : vector<2x32xf32>
    %232 = math.tanh %231 : vector<2x32xf32>
    %233 = arith.mulf %228, %232 : vector<2x32xf32>
    %c0_44 = arith.constant 0 : index
    %c0_45 = arith.constant 0 : index
    %234 = vector.load %arg10[%c0_44, %c0_45] : memref<2x32xf32, #tpu.memory_space<vmem>>, vector<2x32xf32>
    tpu.vector_store %arg10[%c0_44, %c0_45], %233 {strides = array<i32>} : memref<2x32xf32, #tpu.memory_space<vmem>>, vector<2x32xf32>,
    %c0_46 = arith.constant 0 : index
    %c0_47 = arith.constant 0 : index
    %235 = vector.load %arg11[%c0_46, %c0_47] : memref<2x32xf32, #tpu.memory_space<vmem>>, vector<2x32xf32>
    tpu.vector_store %arg11[%c0_46, %c0_47], %231 {strides = array<i32>} : memref<2x32xf32, #tpu.memory_space<vmem>>, vector<2x32xf32>,
    %236 = tpu.concatenate %37, %65, %93, %121, %149, %177, %205, %233 in 0 : vector<2x32xf32>, vector<2x32xf32>, vector<2x32xf32>, vector<2x32xf32>, vector<2x32xf32>, vector<2x32xf32>, vector<2x32xf32>, vector<2x32xf32> -> vector<16x32xf32>
    %c0_48 = arith.constant 0 : index
    %c0_49 = arith.constant 0 : index
    %237 = vector.load %arg5[%c0_48, %c0_49] : memref<32x128xf32, #tpu.memory_space<vmem>>, vector<32x128xf32>
    %cst_50 = arith.constant dense<0.000000e+00> : vector<16x128xf32>
    %238 = tpu.matmul %236, %237, %cst_50 {dimension_numbers = #tpu.dot_dimension_numbers<[1], [0], [0], [1], [0, 0, 1, 1], [], []>} : vector<16x32xf32>, vector<32x128xf32>, vector<16x128xf32> -> vector<16x128xf32>
    %c0_51 = arith.constant 0 : index
    %c0_52 = arith.constant 0 : index
    %239 = vector.load %arg6[%c0_51, %c0_52] : memref<1x128xf32, #tpu.memory_space<vmem>>, vector<1x128xf32>
    %240 = vector.broadcast %239 : vector<1x128xf32> to vector<16x128xf32>
    %241 = arith.addf %238, %240 : vector<16x128xf32>
    %242 = vector.shape_cast %241 : vector<16x128xf32> to vector<8x2x128xf32>
    %c0_53 = arith.constant 0 : index
    %c0_54 = arith.constant 0 : index
    %c0_55 = arith.constant 0 : index
    %243 = vector.load %arg9[%c0_53, %c0_54, %c0_55] : memref<8x2x128xf32, #tpu.memory_space<vmem>>, vector<8x2x128xf32>
    tpu.vector_store %arg9[%c0_53, %c0_54, %c0_55], %242 {strides = array<i32>} : memref<8x2x128xf32, #tpu.memory_space<vmem>>, vector<8x2x128xf32>,
    return
  }
  func.func @transform_0(%arg0: i32) -> (i32, i32, i32) {
    %c0_i32 = arith.constant 0 : i32
    %c0_i32_0 = arith.constant 0 : i32
    %c0_i32_1 = arith.constant 0 : i32
    %c0_i32_2 = arith.constant 0 : i32
    return %c0_i32, %c0_i32_0, %c0_i32_1 : i32, i32, i32
  }
  func.func @transform_1(%arg0: i32) -> (i32, i32) {
    %c0_i32 = arith.constant 0 : i32
    %c0_i32_0 = arith.constant 0 : i32
    %c0_i32_1 = arith.constant 0 : i32
    return %c0_i32, %c0_i32_0 : i32, i32
  }
  func.func @transform_2(%arg0: i32) -> (i32, i32) {
    %c0_i32 = arith.constant 0 : i32
    %c0_i32_0 = arith.constant 0 : i32
    %c0_i32_1 = arith.constant 0 : i32
    return %c0_i32, %c0_i32_0 : i32, i32
  }
  func.func @transform_3(%arg0: i32) -> (i32, i32) {
    %c0_i32 = arith.constant 0 : i32
    %c0_i32_0 = arith.constant 0 : i32
    %c0_i32_1 = arith.constant 0 : i32
    return %c0_i32, %c0_i32_0 : i32, i32
  }
  func.func @transform_4(%arg0: i32) -> (i32, i32) {
    %c0_i32 = arith.constant 0 : i32
    %c0_i32_0 = arith.constant 0 : i32
    %c0_i32_1 = arith.constant 0 : i32
    return %c0_i32, %c0_i32_0 : i32, i32
  }
  func.func @transform_5(%arg0: i32) -> (i32, i32) {
    %c0_i32 = arith.constant 0 : i32
    %c0_i32_0 = arith.constant 0 : i32
    %c0_i32_1 = arith.constant 0 : i32
    return %c0_i32, %c0_i32_0 : i32, i32
  }
  func.func @transform_6(%arg0: i32) -> (i32, i32) {
    %c0_i32 = arith.constant 0 : i32
    %c0_i32_0 = arith.constant 0 : i32
    %c0_i32_1 = arith.constant 0 : i32
    return %c0_i32, %c0_i32_0 : i32, i32
  }
  func.func @transform_7(%arg0: i32) -> (i32, i32) {
    %c0_i32 = arith.constant 0 : i32
    %c0_i32_0 = arith.constant 0 : i32
    %c0_i32_1 = arith.constant 0 : i32
    return %c0_i32, %c0_i32_0 : i32, i32
  }
  func.func @transform_8(%arg0: i32) -> (i32, i32, i32) {
    %c0_i32 = arith.constant 0 : i32
    %c0_i32_0 = arith.constant 0 : i32
    %c0_i32_1 = arith.constant 0 : i32
    %c0_i32_2 = arith.constant 0 : i32
    return %c0_i32, %c0_i32_0, %c0_i32_1 : i32, i32, i32
  }
  func.func @transform_9(%arg0: i32) -> (i32, i32) {
    %c0_i32 = arith.constant 0 : i32
    %c0_i32_0 = arith.constant 0 : i32
    %c0_i32_1 = arith.constant 0 : i32
    return %c0_i32, %c0_i32_0 : i32, i32
  }
  func.func @transform_10(%arg0: i32) -> (i32, i32) {
    %c0_i32 = arith.constant 0 : i32
    %c0_i32_0 = arith.constant 0 : i32
    %c0_i32_1 = arith.constant 0 : i32
    return %c0_i32, %c0_i32_0 : i32, i32
  }
}

</mosaic_0001>

<bundles_post_ra>
// kernel: tpu_custom_call.1
= control target key start
LH: loop header
LB: loop body
LE: loop exit
PB: predicated region body
PF: predicated region fallthrough
CT: control target
= control target key end

     0   :  { %16 = vsyncpa [#allocation3], 0  ;;  %s1467_s0 = inlined_call_operand.hbm [shape: f32[8,2,50], index: 0, kind: input, shape index: {}]   ;;  %s1468_s1 = inlined_call_operand.hbm [shape: f32[50,128], index: 1, kind: input, shape index: {}]   ;;  %s1469_s2 = inlined_call_operand.hbm [shape: f32[32,128], index: 2, kind: input, shape index: {}]   ;;  %s1470_s3 = inlined_call_operand.hbm [shape: f32[1,128], index: 3, kind: input, shape index: {}]   ;;  %s1471_s4 = inlined_call_operand.hbm [shape: f32[32,128], index: 4, kind: input, shape index: {}]   ;;  %s1472_s5 = inlined_call_operand.hbm [shape: f32[1,128], index: 5, kind: input, shape index: {}]   ;;  %s1473_s6 = inlined_call_operand.vmem [shape: f32[2,32], index: 6, kind: input, shape index: {}]   ;;  %s1474_s7 = inlined_call_operand.vmem [shape: f32[2,32], index: 7, kind: input, shape index: {}]   ;;  %s1475_s8 = inlined_call_operand.hbm [shape: f32[8,2,128], index: 8, kind: output, shape index: {0}]   ;;  %s1476_s9 = inlined_call_operand.hbm [shape: f32[2,32], index: 9, kind: output, shape index: {1}]   ;;  %s1477_s10 = inlined_call_operand.hbm [shape: f32[2,32], index: 10, kind: output, shape index: {2}]  }
   0x1   :  { %17 = vsyncpa [#allocation6], 0 }
   0x2   :  { %18 = vsyncpa [#allocation9], 0 }
   0x3   :  { %19 = vsyncpa [#allocation12], 0 }
   0x4   :  { %20 = vsyncpa [#allocation4], 0  ;;  %s39_s15 = sshll.u32 %s1468_s1, 4  ;;  %s40_s15 = int_to_ptr.hbm [resolvable:$true] %s39_s15 }
   0x5   :  { %21 = vsyncpa [#allocation15], 0  ;;  %s1222_s16 = smov [#allocation5]   ;;  %s66_s20 = sshll.u32 %s1470_s3, 4  ;;  %s67_s20 = int_to_ptr.hbm [resolvable:$true] %s66_s20 }
   0x6   :  { %s41_s17 = sshll.u32 %s1222_s16, 4  ;;  %s1223_s21 = smov 128   ;;  %s42_s17 = int_to_ptr.vmem [resolvable:$true] %s41_s17 }
   0x7   :  { %s1224_s22 = smov 8   ;;  %s1225_s23 = smov [#allocation8]  }
   0x8   :  { %47 = dma.hbm_to_vmem [thread:$0]  %s40_s15, 896, %s42_s17, [#allocation6], %s1223_s21, %s1223_s21, %s1224_s22  }
   0x9   :  { %s68_s24 = sshll.u32 %s1225_s23, 4  ;;  %s26_s26 = sshll.u32 %s1467_s0, 4  ;;  %s69_s24 = int_to_ptr.vmem [resolvable:$true] %s68_s24  ;;  %s27_s26 = int_to_ptr.hbm [resolvable:$true] %s26_s26 }
   0xa   :  { %71 = dma.hbm_to_vmem [thread:$0]  %s67_s20, 16, %s69_s24, [#allocation9]  }
   0xb   :  { %s1226_s27 = smov [#allocation2]   ;;  %s52_s30 = sshll.u32 %s1469_s2, 4  ;;  %s53_s30 = int_to_ptr.hbm [resolvable:$true] %s52_s30 }
   0xc   :  { %s28_s28 = sshll.u32 %s1226_s27, 4  ;;  %s1227_s11 = smov 32   ;;  %s29_s28 = int_to_ptr.vmem [resolvable:$true] %s28_s28 }
   0xd   :  { %s1228_s12 = smov 2   ;;  %s1229_s13 = smov [#allocation7]  }
   0xe   :  { %34 = dma.hbm_to_vmem [thread:$0]  %s27_s26, 256, %s29_s28, [#allocation3], %s1227_s11, %s1227_s11, %s1228_s12  }
   0xf   :  { %s54_s14 = sshll.u32 %s1229_s13, 4  ;;  %s76_s16 = sshll.u32 %s1471_s4, 4  ;;  %s55_s14 = int_to_ptr.vmem [resolvable:$true] %s54_s14  ;;  %s77_s16 = int_to_ptr.hbm [resolvable:$true] %s76_s16 }
  0x10   :  { %60 = dma.hbm_to_vmem [thread:$0]  %s53_s30, 512, %s55_s14, [#allocation6], %s1223_s21, %s1223_s21, %s1224_s22  }
  0x11   :  { %s90_s18 = sshll.u32 %s1472_s5, 4  ;;  %s1230_s19 = smov [#allocation10]   ;;  %s91_s18 = int_to_ptr.hbm [resolvable:$true] %s90_s18 }
  0x12   :  { %s78_s20 = sshll.u32 %s1230_s19, 4  ;;  %s1231_s23 = smov [#allocation11]   ;;  %s79_s20 = int_to_ptr.vmem [resolvable:$true] %s78_s20 }
  0x13   :  { %84 = dma.hbm_to_vmem [thread:$0]  %s77_s16, 512, %s79_s20, [#allocation9], %s1223_s21, %s1223_s21, %s1224_s22  }
  0x14   :  { %s92_s4 = sshll.u32 %s1231_s23, 4  ;;  %s93_s4 = int_to_ptr.vmem [resolvable:$true] %s92_s4 }
  0x15   :  { %95 = dma.hbm_to_vmem [thread:$0]  %s91_s18, 16, %s93_s4, [#allocation12]  }
  0x16   :  { %1210 = dma.done.wait [#allocation3], 256  }
  0x17   :  { %1211 = vsyncadd [#allocation3], 4294967040 }
  0x18   :  { %1212 = dma.done.wait [#allocation6], 1408  }
  0x19   :  { %1213 = vsyncadd [#allocation6], 4294965888 }
  0x1a   :  { %1214 = dma.done.wait [#allocation9], 528  }
  0x1b   :  { %1215 = vsyncadd [#allocation9], 4294966768 }
  0x1c   :  { %1216 = dma.done.wait [#allocation12], 16  }
  0x1d   :  { %1217 = vsyncadd [#allocation12], 4294967280  ;;  %vm173_vm0 = vcmask 1041408   ;;  %v138_v0 = vld [vmem:[#allocation5 + $0x30] sm:$0x3]  ;;  %v137_v1 = vld [vmem:[#allocation5 + $0x28] sm:$0xff] }
  0x1e   :  { %892 = vmatpush.msk.msra.mxu0 %vm173_vm0, %v138_v0  ;;  %v1323_v2 = vld [vmem:[#allocation7 + $0x18] sm:$0xff]  ;;  %v136_v3 = vld [vmem:[#allocation5 + $0x20] sm:$0xff]  ;;  %v135_v4 = vld [vmem:[#allocation5 + $0x18] sm:$0xff]  ;;  %vm206_vm1 = vcmask 261120   ;;  %vm168_vm2 = vcmask 408576   ;;  %vm769_vm15 = vcmask 1043456  }
  0x1f   :  { %222 = vmatpush.msra.mxu1 %v1323_v2  ;;  %v1326_v5 = vld [vmem:[#allocation7 + $0x10] sm:$0xff]  ;;  %289 = vmatpush.msra.mxu2 %v1323_v2  ;;  %v1329_v6 = vld [vmem:[#allocation7 + $0x8] sm:$0xff]  ;;  %v124_v7 = vld [vmem:[#allocation2] sm:$0x3]  ;;  %s1234_s25 = smov [#allocation14]   ;;  %s859_s28 = sshll.u32 %s1476_s9, 4  ;;  %s860_s28 = int_to_ptr.hbm [resolvable:$true] %s859_s28 }
  0x20   :  { %187 = vmatpush.msra.mxu0 %v137_v1  ;;  %v125_v8 = vld [vmem:[#allocation2 + $0x2] sm:$0x3]  ;;  %565 = vmatpush.msra.mxu3 %v1323_v2  ;;  %v126_v9 = vld [vmem:[#allocation2 + $0x4] sm:$0x3]  ;;  %v127_v10 = vld [vmem:[#allocation2 + $0x6] sm:$0x3] }
  0x21   :  { %223 = vmatpush.msra.mxu1 %v1326_v5  ;;  %151 = vst [vmem:[#allocation1] ss:$4 sm:$0xff] %v124_v7  ;;  %290 = vmatpush.msra.mxu2 %v1326_v5  ;;  %v134_v11 = vld [vmem:[#allocation5 + $0x10] sm:$0xff]  ;;  %v1334_v12 = vld [vmem:[#allocation7] sm:$0xff]  ;;  %v204_v13 = vld [vmem:[%s1473_s6] sm:$0x3] }
  0x22   :  { %188 = vmatpush.msra.mxu0 %v136_v3  ;;  %153 = vst [vmem:[#allocation1 + $0x1] ss:$4 sm:$0xff] %v125_v8  ;;  %566 = vmatpush.msra.mxu3 %v1326_v5  ;;  %v133_v14 = vld [vmem:[#allocation5 + $0x8] sm:$0xff]  ;;  %v132_v15 = vld [vmem:[#allocation5] sm:$0xff]  ;;  %v1364_v17 = vld [vmem:[#allocation8] ss:$0 sm:$0xff] }
  0x23   :  { %224 = vmatpush.msra.mxu1 %v1329_v6  ;;  %155 = vst [vmem:[#allocation1 + $0x2] ss:$4 sm:$0xff] %v126_v9  ;;  %291 = vmatpush.msra.mxu2 %v1329_v6  ;;  %s1232_s6 = smov 64   ;;  %v205_v23 = vld [vmem:[%s1474_s7] sm:$0x3]  ;;  %s1233_s7 = smov 96  }
  0x24   :  { %189 = vmatpush.msra.mxu0 %v135_v4  ;;  %157 = vst [vmem:[#allocation1 + $0x3] ss:$4 sm:$0xff] %v127_v10  ;;  %567 = vmatpush.msra.mxu3 %v1329_v6  ;;  %v128_v7 = vld [vmem:[#allocation2 + $0x8] sm:$0x3]  ;;  %v129_v8 = vld [vmem:[#allocation2 + $0xa] sm:$0x3] }
  0x25   :  { %225 = vmatpush.msra.mxu1 %v1334_v12  ;;  %292 = vmatpush.msra.mxu2 %v1334_v12  ;;  %v130_v9 = vld [vmem:[#allocation2 + $0xc] sm:$0x3]  ;;  %v131_v10 = vld [vmem:[#allocation2 + $0xe] sm:$0x3]  ;;  %159 = vst [vmem:[#allocation1 + $0x20] ss:$4 sm:$0xff] %v128_v7 }
  0x26   :  { %190 = vmatpush.msra.mxu0 %v134_v11  ;;  %895 = vmatmul.msk.f32.vlgmr.msra.gmra.mxu1 %vm206_vm1, %v204_v13  ;;  %161 = vst [vmem:[#allocation1 + $0x21] ss:$4 sm:$0xff] %v129_v8  ;;  %s857_s1 = sshll.u32 %s1234_s25, 4  ;;  %s1235_s3 = smov [#allocation16]   ;;  %s858_s1 = int_to_ptr.vmem [resolvable:$true] %s857_s1 }
  0x27   :  { %429 = vmatpush.msrb.mxu1 %v1323_v2  ;;  %499 = vmatpush.msrb.mxu2 %v1323_v2  ;;  %163 = vst [vmem:[#allocation1 + $0x22] ss:$4 sm:$0xff] %v130_v9  ;;  %s868_s29 = sshll.u32 %s1235_s3, 4  ;;  %s870_s14 = sshll.u32 %s1477_s10, 4  ;;  %s869_s29 = int_to_ptr.vmem [resolvable:$true] %s868_s29  ;;  %s871_s14 = int_to_ptr.hbm [resolvable:$true] %s870_s14 }
  0x28   :  { %191 = vmatpush.msra.mxu0 %v133_v14  ;;  %568 = vmatpush.msra.mxu3 %v1334_v12  ;;  %165 = vst [vmem:[#allocation1 + $0x23] ss:$4 sm:$0xff] %v131_v10  ;;  %s1236_s0 = smov [#allocation13]   ;;  %s845_s9 = sshll.u32 %s1475_s8, 4  ;;  %s846_s9 = int_to_ptr.hbm [resolvable:$true] %s845_s9 }
  0x29   :  { %430 = vmatpush.msrb.mxu1 %v1326_v5  ;;  %500 = vmatpush.msrb.mxu2 %v1326_v5  ;;  %s843_s15 = sshll.u32 %s1236_s0, 4  ;;  %s844_s15 = int_to_ptr.vmem [resolvable:$true] %s843_s15 }
  0x2a   :  { %192 = vmatpush.msra.mxu0 %v132_v15 }
  0x2b   :  { %v166_v16 = vld.sshfl [vmem:[#allocation1] sm:$0xff pattern:$0x73625140]  ;;  %431 = vmatpush.msrb.mxu1 %v1329_v6  ;;  %501 = vmatpush.msrb.mxu2 %v1329_v6 }
  0x2c   :  { %359 = vmatpush.msrb.mxu0 %v1323_v2 }
  0x2d   :  { %893 = vmatmul.msk.f32.vlgmr.msra.gmra.mxu0 %vm168_vm2, %v166_v16  ;;  %432 = vmatpush.msrb.mxu1 %v1334_v12 }
  0x2e   :  { %360 = vmatpush.msrb.mxu0 %v1326_v5  ;;  %502 = vmatpush.msrb.mxu2 %v1334_v12 }
  0x2f   :  { %635 = vmatpush.msra.mxu1 %v1323_v2  ;;  %v167_v11 = vld.sshfl [vmem:[#allocation1 + $0x20] sm:$0xff pattern:$0x73625140] }
  0x30   :  { %361 = vmatpush.msrb.mxu0 %v1329_v6 }
  0x31   :  { %636 = vmatpush.msra.mxu1 %v1326_v5 }
  0x32   :  { %362 = vmatpush.msrb.mxu0 %v1334_v12 }
  0x33   :  { %637 = vmatpush.msra.mxu1 %v1329_v6 }
  0x35   :  { %638 = vmatpush.msra.mxu1 %v1334_v12  ;;  %894 = vmatmul.msk.f32.gmra.mxu0 %vm168_vm2, %v167_v11 }
  0xa3   :  { %v227_v19 = vpop.f32.mrf.mxu1 }
  0xaa   :  { %v194_v18 = vpop.f32.mrf.mxu0 }
  0xab   :  { %v1367_v20 = vadd.f32 %v1364_v17, %v194_v18 }
  0xad   :  { %v230_v21 = vadd.f32 %v227_v19, %v1367_v20 }
  0xaf   :  { %930 = vtanh.f32 %v230_v21  ;;  %v896_v24 = vmul.f32 -1.442695, %v230_v21 }
  0xb1   :  { %932 = vpow2.f32 %v896_v24 }
  0xb2   :  { %v1393_v16 = vpop.f32.mrf.mxu0 }
  0xb5   :  { %v931_v22 = vpop.eup %930 }
  0xb6   :  { %257 = vrot.lane.b32.xlu0 %v931_v22, %s1232_s6 }
  0xb7   :  { %v933_v25 = vpop.eup %932 }
  0xb8   :  { %v234_v26 = vadd.f32 1.0, %v933_v25 }
  0xba   :  { %934 = vrcp.f32 %v234_v26  ;;  %v246_v32 = vand.u32 2147483648, %v234_v26  ;;  %vm240_vm4 = vweird.f32 %v234_v26  ;;  %v244_v33 = vand.u32 2147483647, %v234_v26 }
  0xbc   :  { %v247_v35 = vor.u32 1.1754944e-38, %v246_v32  ;;  %vm245_vm6 = vcmp.eq.f32.partialorder %v244_v33, 8.507059e+37 }
  0xbe   :  { %252 = vrot.lane.b32.xlu0 %v205_v23, %s1227_s11 }
  0xc0   :  { %v935_v27 = vpop.eup %934 }
  0xc1   :  { %v236_v28 = vmul.f32 %v935_v27, %v234_v26  ;;  %vm241_vm3 = vweird.f32 %v935_v27 }
  0xc2   :  { %vm242_vm5 = vmor %vm240_vm4, %vm241_vm3 }
  0xc3   :  { %v237_v29 = vsub.f32 1.0, %v236_v28 }
  0xc5   :  { %v238_v30 = vmul.f32 %v935_v27, %v237_v29 }
  0xc7   :  { %v239_v31 = vadd.f32 %v935_v27, %v238_v30 }
  0xc9   :  { %v243_v34 = vsel %vm242_vm5, %v935_v27, %v239_v31 }
  0xca   :  { %v248_v37 = vsel %vm245_vm6, %v247_v35, %v243_v34  ;;  %vm771_vm6 = vcmask 1045504  }
 0x128   :  { %v258_v36 = vpop.permute.xlu0 %257 }
 0x129   :  { %v260_v38 = vmul.f32 %v258_v36, %v248_v37 }
 0x12b   :  { %262 = vrot.lane.b32.xlu1 %v260_v38, %s1227_s11 }
 0x130   :  { %v253_v39 = vpop.permute.xlu0 %252 }
 0x131   :  { %v255_v40 = vmul.f32 %v253_v39, %v248_v37 }
 0x19d   :  { %v263_v41 = vpop.permute.xlu1 %262 }
 0x19e   :  { %v265_v42 = vadd.f32 %v263_v41, %v255_v40 }
 0x1a0   :  { %936 = vtanh.f32 %v265_v42 }
 0x1a6   :  { %v937_v43 = vpop.eup %936 }
 0x1a7   :  { %268 = vrot.lane.b32.xlu1 %v937_v43, %s1232_s6 }
 0x219   :  { %v269_v44 = vpop.permute.xlu1 %268 }
 0x21a   :  { %v1377_v45 = vmul.f32 %v269_v44, %v248_v37 }
 0x21c   :  { %273 = vrot.lane.b32.xlu2 %v1377_v45, %s1227_s11 }
 0x276   :  { %v274_v46 = vpop.permute.xlu2 %273 }
 0x277   :  { %897 = vmatmul.msk.f32.vlgmr.msra.gmra.mxu2 %vm206_vm1, %v274_v46 }
 0x278   :  { %705 = vmatpush.msra.mxu2 %v1323_v2  ;;  %v322_v2 = vrot.slane %v265_v42, 6 }
 0x27a   :  { %706 = vmatpush.msra.mxu2 %v1326_v5 }
 0x27c   :  { %707 = vmatpush.msra.mxu2 %v1329_v6 }
 0x27e   :  { %708 = vmatpush.msra.mxu2 %v1334_v12 }
 0x2fa   :  { %v294_v47 = vpop.f32.mrf.mxu2 }
 0x2fb   :  { %v298_v48 = vrot.slane %v294_v47, 6 }
 0x2fd   :  { %v300_v49 = vadd.f32 %v298_v48, %v1367_v20 }
 0x2ff   :  { %938 = vtanh.f32 %v300_v49  ;;  %v898_v51 = vmul.f32 -1.442695, %v300_v49 }
 0x301   :  { %940 = vpow2.f32 %v898_v51 }
 0x305   :  { %v939_v50 = vpop.eup %938 }
 0x306   :  { %326 = vrot.lane.b32.xlu2 %v939_v50, %s1232_s6 }
 0x307   :  { %v941_v52 = vpop.eup %940 }
 0x308   :  { %v304_v53 = vadd.f32 1.0, %v941_v52 }
 0x30a   :  { %942 = vrcp.f32 %v304_v53  ;;  %v316_v59 = vand.u32 2147483648, %v304_v53  ;;  %vm310_vm8 = vweird.f32 %v304_v53  ;;  %v314_v60 = vand.u32 2147483647, %v304_v53 }
 0x30c   :  { %v317_v62 = vor.u32 1.1754944e-38, %v316_v59  ;;  %vm315_vm10 = vcmp.eq.f32.partialorder %v314_v60, 8.507059e+37 }
 0x310   :  { %v943_v54 = vpop.eup %942 }
 0x311   :  { %v306_v55 = vmul.f32 %v943_v54, %v304_v53  ;;  %vm311_vm7 = vweird.f32 %v943_v54 }
 0x312   :  { %vm312_vm9 = vmor %vm310_vm8, %vm311_vm7 }
 0x313   :  { %v307_v56 = vsub.f32 1.0, %v306_v55 }
 0x315   :  { %v308_v57 = vmul.f32 %v943_v54, %v307_v56 }
 0x317   :  { %v309_v58 = vadd.f32 %v943_v54, %v308_v57 }
 0x319   :  { %v313_v61 = vsel %vm312_vm9, %v943_v54, %v309_v58 }
 0x31a   :  { %v318_v0 = vsel %vm315_vm10, %v317_v62, %v313_v61 }
 0x31b   :  { %v324_v3 = vmul.f32 %v322_v2, %v318_v0 }
 0x360   :  { %v327_v63 = vpop.permute.xlu2 %326 }
 0x361   :  { %v329_v1 = vmul.f32 %v327_v63, %v318_v0 }
 0x363   :  { %331 = vrot.lane.b32.xlu0 %v329_v1, %s1227_s11 }
 0x3d5   :  { %v332_v4 = vpop.permute.xlu0 %331 }
 0x3d6   :  { %v334_v5 = vadd.f32 %v332_v4, %v324_v3 }
 0x3d8   :  { %944 = vtanh.f32 %v334_v5  ;;  %v392_v38 = vrot.slane %v334_v5, 6 }
 0x3de   :  { %v945_v6 = vpop.eup %944 }
 0x3df   :  { %337 = vrot.lane.b32.xlu1 %v945_v6, %s1232_s6 }
 0x451   :  { %v338_v12 = vpop.permute.xlu1 %337 }
 0x452   :  { %v340_v13 = vmul.f32 %v338_v12, %v318_v0 }
 0x454   :  { %v342_v14 = vrot.slane %v340_v13, 2  ;;  %v768_v46 = vsel %vm173_vm0, %v1377_v45, %v340_v13  ;;  %v1415_v13 = vadd.f32 %v1364_v17, %v1393_v16 }
 0x456   :  { %343 = vrot.lane.b32.xlu2 %v342_v14, %s1227_s11 }
 0x4b0   :  { %v344_v15 = vpop.permute.xlu2 %343 }
 0x4b1   :  { %899 = vmatmul.msk.f32.vlgmr.msrb.gmra.mxu0 %vm206_vm1, %v344_v15 }
 0x52e   :  { %v364_v18 = vpop.f32.mrf.mxu0 }
 0x52f   :  { %v368_v19 = vrot.slane %v364_v18, 4 }
 0x531   :  { %v370_v21 = vadd.f32 %v368_v19, %v1367_v20 }
 0x533   :  { %946 = vtanh.f32 %v370_v21  ;;  %v900_v23 = vmul.f32 -1.442695, %v370_v21 }
 0x535   :  { %948 = vpow2.f32 %v900_v23 }
 0x539   :  { %v947_v22 = vpop.eup %946 }
 0x53a   :  { %396 = vrot.lane.b32.xlu0 %v947_v22, %s1232_s6 }
 0x53b   :  { %v949_v24 = vpop.eup %948 }
 0x53c   :  { %v374_v25 = vadd.f32 1.0, %v949_v24 }
 0x53e   :  { %950 = vrcp.f32 %v374_v25  ;;  %v386_v31 = vand.u32 2147483648, %v374_v25  ;;  %vm380_vm12 = vweird.f32 %v374_v25  ;;  %v384_v32 = vand.u32 2147483647, %v374_v25 }
 0x540   :  { %v387_v34 = vor.u32 1.1754944e-38, %v386_v31  ;;  %vm385_vm14 = vcmp.eq.f32.partialorder %v384_v32, 8.507059e+37 }
 0x544   :  { %v951_v26 = vpop.eup %950 }
 0x545   :  { %v376_v27 = vmul.f32 %v951_v26, %v374_v25  ;;  %vm381_vm11 = vweird.f32 %v951_v26 }
 0x546   :  { %vm382_vm13 = vmor %vm380_vm12, %vm381_vm11 }
 0x547   :  { %v377_v28 = vsub.f32 1.0, %v376_v27 }
 0x549   :  { %v378_v29 = vmul.f32 %v951_v26, %v377_v28 }
 0x54b   :  { %v379_v30 = vadd.f32 %v951_v26, %v378_v29 }
 0x54d   :  { %v383_v33 = vsel %vm382_vm13, %v951_v26, %v379_v30 }
 0x54e   :  { %v388_v36 = vsel %vm385_vm14, %v387_v34, %v383_v33 }
 0x54f   :  { %v394_v39 = vmul.f32 %v392_v38, %v388_v36 }
 0x5ac   :  { %v397_v35 = vpop.permute.xlu0 %396 }
 0x5ad   :  { %v399_v37 = vmul.f32 %v397_v35, %v388_v36 }
 0x5af   :  { %401 = vrot.lane.b32.xlu1 %v399_v37, %s1227_s11 }
 0x621   :  { %v402_v40 = vpop.permute.xlu1 %401 }
 0x622   :  { %v404_v41 = vadd.f32 %v402_v40, %v394_v39 }
 0x624   :  { %952 = vtanh.f32 %v404_v41  ;;  %v462_v3 = vrot.slane %v404_v41, 6 }
 0x62a   :  { %v953_v42 = vpop.eup %952 }
 0x62b   :  { %407 = vrot.lane.b32.xlu2 %v953_v42, %s1232_s6 }
 0x685   :  { %v408_v43 = vpop.permute.xlu2 %407 }
 0x686   :  { %v410_v44 = vmul.f32 %v408_v43, %v388_v36 }
 0x688   :  { %v412_v47 = vrot.slane %v410_v44, 4  ;;  %v770_v48 = vsel %vm769_vm15, %v768_v46, %v410_v44 }
 0x68a   :  { %413 = vrot.lane.b32.xlu0 %v412_v47, %s1227_s11 }
 0x6fc   :  { %v414_v49 = vpop.permute.xlu0 %413 }
 0x6fd   :  { %901 = vmatmul.msk.f32.vlgmr.msrb.gmra.mxu1 %vm206_vm1, %v414_v49 }
 0x77a   :  { %v434_v50 = vpop.f32.mrf.mxu1 }
 0x77b   :  { %v438_v51 = vrot.slane %v434_v50, 2 }
 0x77d   :  { %v440_v52 = vadd.f32 %v438_v51, %v1367_v20 }
 0x77f   :  { %954 = vtanh.f32 %v440_v52  ;;  %v902_v54 = vmul.f32 -1.442695, %v440_v52 }
 0x781   :  { %956 = vpow2.f32 %v902_v54 }
 0x785   :  { %v955_v53 = vpop.eup %954 }
 0x786   :  { %466 = vrot.lane.b32.xlu1 %v955_v53, %s1232_s6 }
 0x787   :  { %v957_v55 = vpop.eup %956 }
 0x788   :  { %v444_v45 = vadd.f32 1.0, %v957_v55 }
 0x78a   :  { %958 = vrcp.f32 %v444_v45  ;;  %v456_v61 = vand.u32 2147483648, %v444_v45  ;;  %vm450_vm3 = vweird.f32 %v444_v45  ;;  %v454_v62 = vand.u32 2147483647, %v444_v45 }
 0x78c   :  { %v457_v63 = vor.u32 1.1754944e-38, %v456_v61  ;;  %vm455_vm5 = vcmp.eq.f32.partialorder %v454_v62, 8.507059e+37 }
 0x790   :  { %v959_v56 = vpop.eup %958 }
 0x791   :  { %v446_v57 = vmul.f32 %v959_v56, %v444_v45  ;;  %vm451_vm2 = vweird.f32 %v959_v56 }
 0x792   :  { %vm452_vm4 = vmor %vm450_vm3, %vm451_vm2 }
 0x793   :  { %v447_v58 = vsub.f32 1.0, %v446_v57 }
 0x795   :  { %v448_v59 = vmul.f32 %v959_v56, %v447_v58 }
 0x797   :  { %v449_v60 = vadd.f32 %v959_v56, %v448_v59 }
 0x799   :  { %v453_v20 = vsel %vm452_vm4, %v959_v56, %v449_v60 }
 0x79a   :  { %v458_v1 = vsel %vm455_vm5, %v457_v63, %v453_v20 }
 0x79b   :  { %v464_v4 = vmul.f32 %v462_v3, %v458_v1 }
 0x7f8   :  { %v467_v0 = vpop.permute.xlu1 %466 }
 0x7f9   :  { %v469_v2 = vmul.f32 %v467_v0, %v458_v1 }
 0x7fb   :  { %471 = vrot.lane.b32.xlu2 %v469_v2, %s1227_s11 }
 0x855   :  { %v472_v5 = vpop.permute.xlu2 %471 }
 0x856   :  { %v474_v6 = vadd.f32 %v472_v5, %v464_v4 }
 0x858   :  { %960 = vtanh.f32 %v474_v6  ;;  %v529_v33 = vrot.slane %v474_v6, 6 }
 0x85e   :  { %v961_v7 = vpop.eup %960 }
 0x85f   :  { %477 = vrot.lane.b32.xlu0 %v961_v7, %s1232_s6 }
 0x8d1   :  { %v478_v8 = vpop.permute.xlu0 %477 }
 0x8d2   :  { %v480_v9 = vmul.f32 %v478_v8, %v458_v1 }
 0x8d4   :  { %v482_v10 = vrot.slane %v480_v9, 6  ;;  %v1409_v11 = vsel %vm771_vm6, %v770_v48, %v480_v9 }
 0x8d6   :  { %483 = vrot.lane.b32.xlu1 %v482_v10, %s1227_s11 }
 0x948   :  { %v484_v12 = vpop.permute.xlu1 %483 }
 0x949   :  { %903 = vmatmul.msk.f32.vlgmr.msrb.gmra.mxu2 %vm206_vm1, %v484_v12 }
 0x9cc   :  { %v504_v14 = vpop.f32.mrf.mxu2 }
 0x9cd   :  { %v507_v15 = vadd.f32 %v504_v14, %v1415_v13 }
 0x9cf   :  { %962 = vtanh.f32 %v507_v15  ;;  %v904_v19 = vmul.f32 -1.442695, %v507_v15 }
 0x9d1   :  { %964 = vpow2.f32 %v904_v19 }
 0x9d5   :  { %v963_v18 = vpop.eup %962 }
 0x9d6   :  { %533 = vrot.lane.b32.xlu2 %v963_v18, %s1232_s6 }
 0x9d7   :  { %v965_v21 = vpop.eup %964 }
 0x9d8   :  { %v511_v22 = vadd.f32 1.0, %v965_v21 }
 0x9da   :  { %966 = vrcp.f32 %v511_v22  ;;  %v523_v17 = vand.u32 2147483648, %v511_v22  ;;  %vm517_vm8 = vweird.f32 %v511_v22  ;;  %v521_v16 = vand.u32 2147483647, %v511_v22 }
 0x9dc   :  { %v524_v29 = vor.u32 1.1754944e-38, %v523_v17  ;;  %vm522_vm10 = vcmp.eq.f32.partialorder %v521_v16, 8.507059e+37 }
 0x9e0   :  { %v967_v23 = vpop.eup %966 }
 0x9e1   :  { %v513_v24 = vmul.f32 %v967_v23, %v511_v22  ;;  %vm518_vm7 = vweird.f32 %v967_v23 }
 0x9e2   :  { %vm519_vm9 = vmor %vm517_vm8, %vm518_vm7 }
 0x9e3   :  { %v514_v25 = vsub.f32 1.0, %v513_v24 }
 0x9e5   :  { %v515_v26 = vmul.f32 %v967_v23, %v514_v25 }
 0x9e7   :  { %v516_v27 = vadd.f32 %v967_v23, %v515_v26 }
 0x9e9   :  { %v520_v28 = vsel %vm519_vm9, %v967_v23, %v516_v27  ;;  %vm761_vm9 = vcmask 261126  }
 0x9ea   :  { %v525_v31 = vsel %vm522_vm10, %v524_v29, %v520_v28 }
 0x9eb   :  { %v531_v34 = vmul.f32 %v529_v33, %v525_v31 }
 0xa30   :  { %v534_v30 = vpop.permute.xlu2 %533 }
 0xa31   :  { %v536_v32 = vmul.f32 %v534_v30, %v525_v31 }
 0xa33   :  { %538 = vrot.lane.b32.xlu0 %v536_v32, %s1227_s11 }
 0xaa5   :  { %v539_v35 = vpop.permute.xlu0 %538 }
 0xaa6   :  { %v541_v36 = vadd.f32 %v539_v35, %v531_v34 }
 0xaa8   :  { %968 = vtanh.f32 %v541_v36  ;;  %v598_v60 = vrot.slane %v541_v36, 6 }
 0xaae   :  { %v969_v37 = vpop.eup %968 }
 0xaaf   :  { %544 = vrot.lane.b32.xlu1 %v969_v37, %s1232_s6 }
 0xb21   :  { %v545_v38 = vpop.permute.xlu1 %544 }
 0xb22   :  { %v1421_v39 = vmul.f32 %v545_v38, %v525_v31 }
 0xb24   :  { %549 = vrot.lane.b32.xlu2 %v1421_v39, %s1227_s11 }
 0xb7e   :  { %v550_v40 = vpop.permute.xlu2 %549 }
 0xb7f   :  { %905 = vmatmul.msk.f32.vlgmr.msra.gmra.mxu3 %vm206_vm1, %v550_v40 }
 0xc02   :  { %v570_v41 = vpop.f32.mrf.mxu3 }
 0xc03   :  { %v574_v42 = vrot.slane %v570_v41, 6 }
 0xc05   :  { %v576_v43 = vadd.f32 %v574_v42, %v1415_v13 }
 0xc07   :  { %970 = vtanh.f32 %v576_v43  ;;  %v906_v46 = vmul.f32 -1.442695, %v576_v43 }
 0xc09   :  { %972 = vpow2.f32 %v906_v46  ;;  %v778_v46 = vld [vmem:[#allocation10 + $0x10] sm:$0xff] }
 0xc0d   :  { %v971_v44 = vpop.eup %970 }
 0xc0e   :  { %602 = vrot.lane.b32.xlu0 %v971_v44, %s1232_s6  ;;  %v779_v44 = vld [vmem:[#allocation10 + $0x18] sm:$0xff] }
 0xc0f   :  { %v973_v47 = vpop.eup %972  ;;  %806 = vmatpush.msrb.mxu3 %v779_v44 }
 0xc10   :  { %v580_v48 = vadd.f32 1.0, %v973_v47  ;;  %v777_v47 = vld [vmem:[#allocation10 + $0x8] sm:$0xff] }
 0xc11   :  { %807 = vmatpush.msrb.mxu3 %v778_v46 }
 0xc12   :  { %974 = vrcp.f32 %v580_v48  ;;  %v592_v54 = vand.u32 2147483648, %v580_v48  ;;  %vm586_vm12 = vweird.f32 %v580_v48  ;;  %v590_v55 = vand.u32 2147483647, %v580_v48 }
 0xc13   :  { %808 = vmatpush.msrb.mxu3 %v777_v47 }
 0xc14   :  { %v593_v56 = vor.u32 1.1754944e-38, %v592_v54  ;;  %vm591_vm14 = vcmp.eq.f32.partialorder %v590_v55, 8.507059e+37 }
 0xc18   :  { %v975_v49 = vpop.eup %974 }
 0xc19   :  { %v582_v50 = vmul.f32 %v975_v49, %v580_v48  ;;  %vm587_vm11 = vweird.f32 %v975_v49  ;;  %v776_v48 = vld [vmem:[#allocation10] sm:$0xff] }
 0xc1a   :  { %vm588_vm13 = vmor %vm586_vm12, %vm587_vm11  ;;  %809 = vmatpush.msrb.mxu3 %v776_v48 }
 0xc1b   :  { %v583_v51 = vsub.f32 1.0, %v582_v50 }
 0xc1d   :  { %v584_v52 = vmul.f32 %v975_v49, %v583_v51 }
 0xc1f   :  { %v585_v53 = vadd.f32 %v975_v49, %v584_v52 }
 0xc21   :  { %v589_v45 = vsel %vm588_vm13, %v975_v49, %v585_v53 }
 0xc22   :  { %v594_v58 = vsel %vm591_vm14, %v593_v56, %v589_v45 }
 0xc23   :  { %v600_v61 = vmul.f32 %v598_v60, %v594_v58 }
 0xc80   :  { %v603_v57 = vpop.permute.xlu0 %602 }
 0xc81   :  { %v605_v59 = vmul.f32 %v603_v57, %v594_v58 }
 0xc83   :  { %607 = vrot.lane.b32.xlu1 %v605_v59, %s1227_s11 }
 0xcf5   :  { %v608_v62 = vpop.permute.xlu1 %607 }
 0xcf6   :  { %v610_v20 = vadd.f32 %v608_v62, %v600_v61 }
 0xcf8   :  { %976 = vtanh.f32 %v610_v20  ;;  %v668_v17 = vrot.slane %v610_v20, 6 }
 0xcfe   :  { %v977_v63 = vpop.eup %976 }
 0xcff   :  { %613 = vrot.lane.b32.xlu2 %v977_v63, %s1232_s6  ;;  %v929_v63 = vld [vmem:[#allocation11] ss:$0 sm:$0xff] }
 0xd59   :  { %v614_v0 = vpop.permute.xlu2 %613 }
 0xd5a   :  { %v616_v1 = vmul.f32 %v614_v0, %v594_v58 }
 0xd5c   :  { %v618_v2 = vrot.slane %v616_v1, 2  ;;  %v773_v33 = vsel %vm173_vm0, %v1421_v39, %v616_v1 }
 0xd5e   :  { %619 = vrot.lane.b32.xlu0 %v618_v2, %s1227_s11 }
 0xdd0   :  { %v620_v3 = vpop.permute.xlu0 %619 }
 0xdd1   :  { %907 = vmatmul.msk.f32.vlgmr.msra.gmra.mxu1 %vm206_vm1, %v620_v3 }
 0xe4e   :  { %v640_v4 = vpop.f32.mrf.mxu1 }
 0xe4f   :  { %v644_v5 = vrot.slane %v640_v4, 4 }
 0xe51   :  { %v646_v6 = vadd.f32 %v644_v5, %v1415_v13 }
 0xe53   :  { %978 = vtanh.f32 %v646_v6  ;;  %v908_v8 = vmul.f32 -1.442695, %v646_v6 }
 0xe55   :  { %980 = vpow2.f32 %v908_v8 }
 0xe59   :  { %v979_v7 = vpop.eup %978 }
 0xe5a   :  { %672 = vrot.lane.b32.xlu1 %v979_v7, %s1232_s6 }
 0xe5b   :  { %v981_v9 = vpop.eup %980 }
 0xe5c   :  { %v650_v10 = vadd.f32 1.0, %v981_v9 }
 0xe5e   :  { %982 = vrcp.f32 %v650_v10  ;;  %v662_v21 = vand.u32 2147483648, %v650_v10  ;;  %vm656_vm3 = vweird.f32 %v650_v10  ;;  %v660_v22 = vand.u32 2147483647, %v650_v10 }
 0xe60   :  { %v663_v24 = vor.u32 1.1754944e-38, %v662_v21  ;;  %vm661_vm5 = vcmp.eq.f32.partialorder %v660_v22, 8.507059e+37 }
 0xe64   :  { %v983_v12 = vpop.eup %982 }
 0xe65   :  { %v652_v14 = vmul.f32 %v983_v12, %v650_v10  ;;  %vm657_vm2 = vweird.f32 %v983_v12 }
 0xe66   :  { %vm658_vm4 = vmor %vm656_vm3, %vm657_vm2 }
 0xe67   :  { %v653_v15 = vsub.f32 1.0, %v652_v14 }
 0xe69   :  { %v654_v18 = vmul.f32 %v983_v12, %v653_v15 }
 0xe6b   :  { %v655_v19 = vadd.f32 %v983_v12, %v654_v18 }
 0xe6d   :  { %v659_v23 = vsel %vm658_vm4, %v983_v12, %v655_v19 }
 0xe6e   :  { %v664_v26 = vsel %vm661_vm5, %v663_v24, %v659_v23 }
 0xe6f   :  { %v670_v16 = vmul.f32 %v668_v17, %v664_v26 }
 0xecc   :  { %v673_v25 = vpop.permute.xlu1 %672 }
 0xecd   :  { %v675_v27 = vmul.f32 %v673_v25, %v664_v26 }
 0xecf   :  { %677 = vrot.lane.b32.xlu2 %v675_v27, %s1227_s11 }
 0xf29   :  { %v678_v28 = vpop.permute.xlu2 %677 }
 0xf2a   :  { %v680_v29 = vadd.f32 %v678_v28, %v670_v16 }
 0xf2c   :  { %984 = vtanh.f32 %v680_v29  ;;  %v738_v59 = vrot.slane %v680_v29, 6 }
 0xf32   :  { %v985_v30 = vpop.eup %984 }
 0xf33   :  { %683 = vrot.lane.b32.xlu0 %v985_v30, %s1232_s6 }
 0xfa5   :  { %v684_v31 = vpop.permute.xlu0 %683 }
 0xfa6   :  { %v686_v32 = vmul.f32 %v684_v31, %v664_v26 }
 0xfa8   :  { %v688_v34 = vrot.slane %v686_v32, 4  ;;  %v1439_v35 = vsel %vm769_vm15, %v773_v33, %v686_v32 }
 0xfaa   :  { %689 = vrot.lane.b32.xlu1 %v688_v34, %s1227_s11 }
0x101c   :  { %v690_v36 = vpop.permute.xlu1 %689 }
0x101d   :  { %909 = vmatmul.msk.f32.vlgmr.msra.gmra.mxu2 %vm206_vm1, %v690_v36 }
0x10a0   :  { %v710_v37 = vpop.f32.mrf.mxu2 }
0x10a1   :  { %v714_v38 = vrot.slane %v710_v37, 2 }
0x10a3   :  { %v716_v40 = vadd.f32 %v714_v38, %v1415_v13 }
0x10a5   :  { %986 = vtanh.f32 %v716_v40  ;;  %v910_v39 = vmul.f32 -1.442695, %v716_v40 }
0x10a7   :  { %988 = vpow2.f32 %v910_v39 }
0x10ab   :  { %v987_v41 = vpop.eup %986 }
0x10ac   :  { %742 = vrot.lane.b32.xlu2 %v987_v41, %s1232_s6 }
0x10ad   :  { %v989_v42 = vpop.eup %988 }
0x10ae   :  { %v720_v43 = vadd.f32 1.0, %v989_v42 }
0x10b0   :  { %990 = vrcp.f32 %v720_v43  ;;  %vm726_vm15 = vweird.f32 %v720_v43  ;;  %v730_v53 = vand.u32 2147483647, %v720_v43 }
0x10b2   :  { %vm731_vm8 = vcmp.eq.f32.partialorder %v730_v53, 8.507059e+37 }
0x10b4   :  { %786 = vrot.lane.b32.xlu2 %v1409_v11, %s1227_s11  ;;  %v732_v11 = vand.u32 2147483648, %v720_v43 }
0x10b6   :  { %v991_v13 = vpop.eup %990  ;;  %v733_v55 = vor.u32 1.1754944e-38, %v732_v11 }
0x10b7   :  { %v722_v49 = vmul.f32 %v991_v13, %v720_v43  ;;  %vm727_vm0 = vweird.f32 %v991_v13 }
0x10b8   :  { %vm728_vm7 = vmor %vm726_vm15, %vm727_vm0 }
0x10b9   :  { %v723_v50 = vsub.f32 1.0, %v722_v49 }
0x10bb   :  { %v724_v51 = vmul.f32 %v991_v13, %v723_v50 }
0x10bd   :  { %v725_v52 = vadd.f32 %v991_v13, %v724_v51 }
0x10bf   :  { %v729_v54 = vsel %vm728_vm7, %v991_v13, %v725_v52 }
0x10c0   :  { %v734_v56 = vsel %vm731_vm8, %v733_v55, %v729_v54 }
0x10c1   :  { %v740_v60 = vmul.f32 %v738_v59, %v734_v56 }
0x1106   :  { %v743_v45 = vpop.permute.xlu2 %742 }
0x1107   :  { %v745_v57 = vmul.f32 %v743_v45, %v734_v56 }
0x1109   :  { %747 = vrot.lane.b32.xlu0 %v745_v57, %s1227_s11 }
0x110e   :  { %v787_v58 = vpop.permute.xlu2 %786 }
0x110f   :  { %911 = vmatmul.msk.f32.vlgmr.msrb.gmra.mxu3 %vm206_vm1, %v787_v58 }
0x117b   :  { %v748_v61 = vpop.permute.xlu0 %747 }
0x117c   :  { %v750_v62 = vadd.f32 %v748_v61, %v740_v60 }
0x117e   :  { %992 = vtanh.f32 %v750_v62  ;;  %764 = vrot.lane.b32.xlu2 %v750_v62, %s1233_s7 }
0x1184   :  { %v993_v20 = vpop.eup %992 }
0x1185   :  { %753 = vrot.lane.b32.xlu1 %v993_v20, %s1232_s6 }
0x1192   :  { %v811_v0 = vpop.f32.mrf.mxu3 }
0x1193   :  { %v812_v1 = vadd.f32 %v929_v63, %v811_v0 }
0x1195   :  { %v819_v2 = vrot.slane %v812_v1, 2  ;;  %v820_v3 = vrot.slane %v812_v1, 4  ;;  %v821_v4 = vrot.slane %v812_v1, 6  ;;  %831 = vst [vmem:[#allocation13] sm:$0x3] %v812_v1 }
0x1197   :  { %832 = vst [vmem:[#allocation13 + $0x2] sm:$0x3] %v819_v2 }
0x1198   :  { %833 = vst [vmem:[#allocation13 + $0x4] sm:$0x3] %v820_v3 }
0x1199   :  { %834 = vst [vmem:[#allocation13 + $0x6] sm:$0x3] %v821_v4 }
0x11d8   :  { %v765_v5 = vpop.permute.xlu2 %764 }
0x11d9   :  { %767 = vst.msk [vmem:[#allocation16 - $0x6] sm:$0xc0] %vm761_vm9, %v765_v5 }
0x11f7   :  { %v754_v6 = vpop.permute.xlu1 %753 }
0x11f8   :  { %v756_v7 = vmul.f32 %v754_v6, %v734_v56 }
0x11fa   :  { %758 = vrot.lane.b32.xlu1 %v756_v7, %s1227_s11  ;;  %v775_v8 = vsel %vm771_vm6, %v1439_v35, %v756_v7 }
0x11fb   :  { %788 = vrot.lane.b32.xlu0 %v775_v8, %s1227_s11 }
0x126c   :  { %v759_v9 = vpop.permute.xlu1 %758 }
0x126d   :  { %762 = vst.msk [vmem:[#allocation14 - $0x6] sm:$0xc0] %vm761_vm9, %v759_v9  ;;  %v789_v10 = vpop.permute.xlu0 %788 }
0x126e   :  { %912 = vmatmul.msk.f32.gmra.mxu3 %vm206_vm1, %v789_v10  ;;  %862 = dma.vmem_to_hbm [thread:$0]  %s858_s1, 32, %s860_s28, [#allocation15]  }
0x126f   :  { %873 = dma.vmem_to_hbm [thread:$0]  %s869_s29, 32, %s871_s14, [#allocation15]  }
0x12f1   :  { %v814_v12 = vpop.f32.mrf.mxu3 }
0x12f2   :  { %v815_v14 = vadd.f32 %v929_v63, %v814_v12 }
0x12f4   :  { %v822_v15 = vrot.slane %v815_v14, 2  ;;  %v823_v18 = vrot.slane %v815_v14, 4  ;;  %v824_v19 = vrot.slane %v815_v14, 6  ;;  %835 = vst [vmem:[#allocation13 + $0x8] sm:$0x3] %v815_v14 }
0x12f6   :  { %836 = vst [vmem:[#allocation13 + $0xa] sm:$0x3] %v822_v15 }
0x12f7   :  { %837 = vst [vmem:[#allocation13 + $0xc] sm:$0x3] %v823_v18 }
0x12f8   :  { %838 = vst [vmem:[#allocation13 + $0xe] sm:$0x3] %v824_v19 }
0x12f9   :  { %851 = dma.vmem_to_hbm [thread:$0]  %s844_s15, 256, %s846_s9, [#allocation4], %s1227_s11, %s1227_s11, %s1228_s12  }
0x12fa   :  { %1218 = dma.done.wait [#allocation4], 256  }
0x12fb   :  { %1219 = vsyncadd [#allocation4], 4294967040 }
0x12fc   :  { %1220 = dma.done.wait [#allocation15], 64  }
0x12fd   :  { %1221 = vsyncadd [#allocation15], 4294967232 }
0x12fe   :  { %886 = vsyncpa [#allocation3], 1 }
0x12ff   :  { %887 = vsyncpa [#allocation6], 1 }
0x1300   :  { %888 = vsyncpa [#allocation9], 1 }
0x1301   :  { %889 = vsyncpa [#allocation12], 1 }
0x1302   :  { %890 = vsyncpa [#allocation4], 1 }
0x1303   :  { %891 = vsyncpa [#allocation15], 1 }

</bundles_post_ra>
